<compile_context>
chip_gen: v7x
topology: tpu7x:2x2x1
jax: 0.10.0
libtpu: 0.0.40
codegen_flags: <defaults>
</compile_context>

<pallas_src>
import jax
import jax.numpy as jnp
from jax.experimental import pallas as pl
from jax.experimental.pallas import tpu as pltpu

_MAX_BLOCK_ROWS = 512   # 512 x 512 f32 = 1 MiB per operand per grid step


def _bce_focal_kernel(x_ref, t_ref, e_ref, focal_ref, psum_ref):
    """Fused: elementwise focal weight + per-block weighted-BCE partial sum."""
    x = x_ref[...].astype(jnp.float32)
    t = t_ref[...].astype(jnp.float32)
    e = e_ref[...].astype(jnp.float32)

    # target_weight = 1.0 where edge > 0.8 else 0.0
    w = (e > 0.8).astype(jnp.float32)

    # PyTorch's binary_cross_entropy clamps the log terms at -100.
    log_x = jnp.maximum(jnp.log(x), -100.0)
    log_1mx = jnp.maximum(jnp.log(1.0 - x), -100.0)
    bce = -w * (t * log_x + (1.0 - t) * log_1mx)

    # Vectorized partial sum: collapse row-groups of 8 into an (8, width) tile.
    # This splits only the sublane dim (tile-aligned -> no layout copy); the
    # full reduce happens once in the wrapper.
    rows, width = bce.shape
    psum_ref[...] = bce.reshape(rows // 8, 8, width).sum(axis=0)

    # focal = (0.5*t + (1-0.5)*(1-t)) * pt^2 == 0.5 * pt^2 with pt = x + t - 2xt
    pt = x + t - 2.0 * x * t
    focal_ref[...] = 0.5 * (pt * pt)


def _choose_layout(n):
    """Pick (width, rows, block_rows, needs_pad) for a flat array of n elems.

    Prefer a zero-padding layout (rows * width == n, rows % 8 == 0) with a
    block_rows that evenly divides rows and is not too small; otherwise fall
    back to a padded (rows, 512) layout.
    """
    for width in (512, 256, 128):
        if n % width:
            continue
        rows = n // width
        if rows % 8:
            continue
        br = min(rows, _MAX_BLOCK_ROWS)
        br -= br % 8
        while br >= 64 and rows % br:
            br -= 8
        if br == rows or (br >= 64 and rows % br == 0):
            return width, rows, br, False
    # Fallback: pad to a lane-dense (rows, 512) slab.
    width = 512
    rows = -(-n // width)                 # ceil(n / width)
    rows = ((rows + 7) // 8) * 8          # sublane multiple of 8
    if rows > _MAX_BLOCK_ROWS:
        br = _MAX_BLOCK_ROWS
        rows = ((rows + br - 1) // br) * br
    else:
        br = rows
    return width, rows, br, True


def edge_att_binary_focal_loss(x, target, edge):
    orig_shape = x.shape
    n = x.size

    width, rows, block_rows, needs_pad = _choose_layout(n)
    padded = rows * width
    num_blocks = rows // block_rows

    def _prep(a, fill):
        flat = a.reshape(-1)
        if needs_pad and padded > n:
            # Padding chosen so padded elements contribute zero to the BCE sum
            # (edge pad 0 -> target_weight 0; x pad 0.5 keeps logs finite).
            pad = jnp.full((padded - n,), fill, dtype=flat.dtype)
            flat = jnp.concatenate([flat, pad])
        return flat.reshape(rows, width)

    # Keep native dtypes (kernel casts after load).
    xf = _prep(x, 0.5)
    tf = _prep(target, 0.0)
    ef = _prep(edge, 0.0)

    blk = pl.BlockSpec((block_rows, width), lambda i: (i, 0))

    focal, psums = pl.pallas_call(
        _bce_focal_kernel,
        out_shape=(
            jax.ShapeDtypeStruct((rows, width), jnp.float32),            # focal
            jax.ShapeDtypeStruct((num_blocks * 8, width), jnp.float32),  # partial sums
        ),
        grid=(num_blocks,),
        in_specs=[blk, blk, blk],
        out_specs=(blk, pl.BlockSpec((8, width), lambda i: (i, 0))),
        compiler_params=pltpu.CompilerParams(
            dimension_semantics=("parallel",)),
    )(xf, tf, ef)

    bce_mean = jnp.sum(psums) / jnp.float32(n)
    out = focal * bce_mean
    if needs_pad and padded > n:
        out = out.reshape(-1)[:n]
    return out.reshape(orig_shape)


def _reference(x, t, e):
    """Pure-JAX reference matching the PyTorch forward."""
    w = jnp.where(e > 0.8, 1.0, 0.0)
    log_x = jnp.maximum(jnp.log(x), -100.0)
    log_1mx = jnp.maximum(jnp.log(1.0 - x), -100.0)
    bce_mean = jnp.mean(-w * (t * log_x + (1.0 - t) * log_1mx))
    pt = (1.0 - x) * t + x * (1.0 - t)
    focal = (0.5 * t + 0.5 * (1.0 - t)) * pt ** 2
    return bce_mean * focal


if __name__ == "__main__":
    key = jax.random.PRNGKey(0)
    k1, k2, k3 = jax.random.split(key, 3)
    shape = (2, 4, 16, 16)  # NCHW

    # `input` must be a probability in (0, 1) for BCE.
    x = jax.nn.sigmoid(jax.random.normal(k1, shape, jnp.float32))
    target = (jax.random.uniform(k2, shape) > 0.5).astype(jnp.float32)
    edge = jax.random.uniform(k3, shape, dtype=jnp.float32)

    out = edge_att_binary_focal_loss(x, target, edge)
    out = jax.block_until_ready(out)

    ref = _reference(x, target, edge)
    assert out.shape == shape and out.dtype == jnp.float32
    assert jnp.allclose(out, ref, atol=1e-5, rtol=1e-5), "mismatch vs reference"

    print("KERNEL_OK")
</pallas_src>

<mosaic_0001>
module attributes {stable_mosaic.version = 11 : i64} {
  func.func @_bce_focal_kernel(%arg0: i32, %arg1: memref<8x256xf32, #tpu.memory_space<vmem>>, %arg2: memref<8x256xf32, #tpu.memory_space<vmem>>, %arg3: memref<8x256xf32, #tpu.memory_space<vmem>>, %arg4: memref<8x256xf32, #tpu.memory_space<vmem>>, %arg5: memref<8x256xf32, #tpu.memory_space<vmem>>) attributes {dimension_semantics = [#tpu.dimension_semantics<parallel>], iteration_bounds = array<i64: 1>, scalar_prefetch = 0 : i64, scratch_operands = 0 : i64, tpu.core_type = #tpu.core_type<tc>, window_params = [{transform_indices = @transform_0, window_bounds = array<i64: 8, 256>}, {transform_indices = @transform_1, window_bounds = array<i64: 8, 256>}, {transform_indices = @transform_2, window_bounds = array<i64: 8, 256>}, {transform_indices = @transform_3, window_bounds = array<i64: 8, 256>}, {transform_indices = @transform_4, window_bounds = array<i64: 8, 256>}]} {
    %c0 = arith.constant 0 : index
    %c0_0 = arith.constant 0 : index
    %0 = vector.load %arg1[%c0, %c0_0] : memref<8x256xf32, #tpu.memory_space<vmem>>, vector<8x256xf32>
    %c0_1 = arith.constant 0 : index
    %c0_2 = arith.constant 0 : index
    %1 = vector.load %arg2[%c0_1, %c0_2] : memref<8x256xf32, #tpu.memory_space<vmem>>, vector<8x256xf32>
    %c0_3 = arith.constant 0 : index
    %c0_4 = arith.constant 0 : index
    %2 = vector.load %arg3[%c0_3, %c0_4] : memref<8x256xf32, #tpu.memory_space<vmem>>, vector<8x256xf32>
    %cst = arith.constant 8.000000e-01 : f32
    %3 = vector.broadcast %cst : f32 to vector<8x256xf32>
    %4 = arith.cmpf ogt, %2, %3 : vector<8x256xf32>
    %5 = arith.extui %4 : vector<8x256xi1> to vector<8x256xi32>
    %6 = arith.sitofp %5 : vector<8x256xi32> to vector<8x256xf32>
    %7 = math.log %0 : vector<8x256xf32>
    %cst_5 = arith.constant -1.000000e+02 : f32
    %8 = vector.broadcast %cst_5 : f32 to vector<8x256xf32>
    %9 = arith.maximumf %7, %8 : vector<8x256xf32>
    %cst_6 = arith.constant 1.000000e+00 : f32
    %10 = vector.broadcast %cst_6 : f32 to vector<8x256xf32>
    %11 = arith.subf %10, %0 : vector<8x256xf32>
    %12 = math.log %11 : vector<8x256xf32>
    %cst_7 = arith.constant -1.000000e+02 : f32
    %13 = vector.broadcast %cst_7 : f32 to vector<8x256xf32>
    %14 = arith.maximumf %12, %13 : vector<8x256xf32>
    %cst_8 = arith.constant 0.000000e+00 : f32
    %15 = vector.broadcast %cst_8 : f32 to vector<8x256xf32>
    %16 = arith.subf %15, %6 : vector<8x256xf32>
    %17 = arith.mulf %1, %9 : vector<8x256xf32>
    %cst_9 = arith.constant 1.000000e+00 : f32
    %18 = vector.broadcast %cst_9 : f32 to vector<8x256xf32>
    %19 = arith.subf %18, %1 : vector<8x256xf32>
    %20 = arith.mulf %19, %14 : vector<8x256xf32>
    %21 = arith.addf %17, %20 : vector<8x256xf32>
    %22 = arith.mulf %16, %21 : vector<8x256xf32>
    %23 = vector.shape_cast %22 : vector<8x256xf32> to vector<1x8x256xf32>
    %cst_10 = arith.constant dense<0.000000e+00> : vector<8x256xf32>
    %24 = vector.multi_reduction <add>, %23, %cst_10 [0] : vector<1x8x256xf32> to vector<8x256xf32>
    %c0_11 = arith.constant 0 : index
    %c0_12 = arith.constant 0 : index
    %25 = vector.load %arg5[%c0_11, %c0_12] : memref<8x256xf32, #tpu.memory_space<vmem>>, vector<8x256xf32>
    tpu.vector_store %arg5[%c0_11, %c0_12], %24 {strides = array<i32>} : memref<8x256xf32, #tpu.memory_space<vmem>>, vector<8x256xf32>,
    %26 = arith.addf %0, %1 : vector<8x256xf32>
    %cst_13 = arith.constant 2.000000e+00 : f32
    %27 = vector.broadcast %cst_13 : f32 to vector<8x256xf32>
    %28 = arith.mulf %27, %0 : vector<8x256xf32>
    %29 = arith.mulf %28, %1 : vector<8x256xf32>
    %30 = arith.subf %26, %29 : vector<8x256xf32>
    %31 = arith.mulf %30, %30 : vector<8x256xf32>
    %cst_14 = arith.constant 5.000000e-01 : f32
    %32 = vector.broadcast %cst_14 : f32 to vector<8x256xf32>
    %33 = arith.mulf %32, %31 : vector<8x256xf32>
    %c0_15 = arith.constant 0 : index
    %c0_16 = arith.constant 0 : index
    %34 = vector.load %arg4[%c0_15, %c0_16] : memref<8x256xf32, #tpu.memory_space<vmem>>, vector<8x256xf32>
    tpu.vector_store %arg4[%c0_15, %c0_16], %33 {strides = array<i32>} : memref<8x256xf32, #tpu.memory_space<vmem>>, vector<8x256xf32>,
    return
  }
  func.func @transform_0(%arg0: i32) -> (i32, i32) {
    %c0_i32 = arith.constant 0 : i32
    %c0_i32_0 = arith.constant 0 : i32
    return %arg0, %c0_i32 : i32, i32
  }
  func.func @transform_1(%arg0: i32) -> (i32, i32) {
    %c0_i32 = arith.constant 0 : i32
    %c0_i32_0 = arith.constant 0 : i32
    return %arg0, %c0_i32 : i32, i32
  }
  func.func @transform_2(%arg0: i32) -> (i32, i32) {
    %c0_i32 = arith.constant 0 : i32
    %c0_i32_0 = arith.constant 0 : i32
    return %arg0, %c0_i32 : i32, i32
  }
  func.func @transform_3(%arg0: i32) -> (i32, i32) {
    %c0_i32 = arith.constant 0 : i32
    %c0_i32_0 = arith.constant 0 : i32
    return %arg0, %c0_i32 : i32, i32
  }
  func.func @transform_4(%arg0: i32) -> (i32, i32) {
    %c0_i32 = arith.constant 0 : i32
    %c0_i32_0 = arith.constant 0 : i32
    return %arg0, %c0_i32 : i32, i32
  }
}

</mosaic_0001>

<bundles_post_ra>
// kernel: tpu_custom_call.1
= control target key start
LH: loop header
LB: loop body
LE: loop exit
PB: predicated region body
PF: predicated region fallthrough
CT: control target
= control target key end

     0   :  { %10 = vsyncpa [#allocation3], 0  ;;  %s371_s0 = inlined_call_operand.hbm [shape: f32[8,256], index: 0, kind: input, shape index: {}]   ;;  %s372_s1 = inlined_call_operand.hbm [shape: f32[8,256], index: 1, kind: input, shape index: {}]   ;;  %s373_s2 = inlined_call_operand.hbm [shape: f32[8,256], index: 2, kind: input, shape index: {}]   ;;  %s374_s3 = inlined_call_operand.hbm [shape: f32[8,256], index: 3, kind: output, shape index: {0}]   ;;  %s375_s4 = inlined_call_operand.hbm [shape: f32[8,256], index: 4, kind: output, shape index: {1}]  }
   0x1   :  { %11 = vsyncpa [#allocation6], 0 }
   0x2   :  { %12 = vsyncpa [#allocation4], 0 }
   0x3   :  { %13 = vsyncpa [#allocation10], 0  ;;  %s273_s15 = smov [#allocation5]   ;;  %s274_s17 = smov [#allocation2]  }
   0x4   :  { %s30_s16 = sshll.u32 %s273_s15, 4  ;;  %s20_s18 = sshll.u32 %s274_s17, 4  ;;  %s31_s16 = int_to_ptr.vmem [resolvable:$true] %s30_s16  ;;  %s21_s18 = int_to_ptr.vmem [resolvable:$true] %s20_s18 }
   0x5   :  { %s155_s21 = scalar_lea.hbm %s372_s1, 256 }
   0x6   :  { %p156_p0 = scmp.ne.s32.totalorder %s372_s1, %s155_s21  ;;  %p159_p1 = scmp.lt.u32.totalorder %s155_s21, %s372_s1 }
   0x8   :  { %p161_p2 = pnand %p159_p1, %p156_p0 }
   0xa   :  { %164 = shalt.err (!%p161_p2)
}
   0xb   :  { %s165_s26 = scalar_lea.vmem %s31_s16, 256  ;;  %p170_p4 = scmp.lt.s32.totalorder %s31_s16, %s31_s16 }
   0xc   :  { %p166_p3 = scmp.ne.s32.totalorder %s31_s16, %s165_s26  ;;  %p171_p5 = scmp.lt.s32.totalorder %s165_s26, %s165_s26 }
   0xe   :  { %p172_p6 = por %p171_p5, %p170_p4 }
  0x10   :  { %p173_p7 = pnand %p172_p6, %p166_p3 }
  0x12   :  { %176 = shalt.err (!%p173_p7)
}
  0x13   :  { %33 = dma.hbm_to_vmem [thread:$0]  %s372_s1, 256, %s31_s16, [#allocation6]  }
  0x14   :  { %s177_s5 = scalar_lea.hbm %s371_s0, 256 }
  0x15   :  { %p178_p8 = scmp.ne.s32.totalorder %s371_s0, %s177_s5  ;;  %p181_p9 = scmp.lt.u32.totalorder %s177_s5, %s371_s0 }
  0x17   :  { %p183_p10 = pnand %p181_p9, %p178_p8 }
  0x19   :  { %186 = shalt.err (!%p183_p10)
}
  0x1a   :  { %s187_s10 = scalar_lea.vmem %s21_s18, 256  ;;  %p192_p12 = scmp.lt.s32.totalorder %s21_s18, %s21_s18 }
  0x1b   :  { %p188_p11 = scmp.ne.s32.totalorder %s21_s18, %s187_s10  ;;  %p193_p13 = scmp.lt.s32.totalorder %s187_s10, %s187_s10 }
  0x1d   :  { %p194_p0 = por %p193_p13, %p192_p12 }
  0x1f   :  { %p195_p1 = pnand %p194_p0, %p188_p11 }
  0x21   :  { %198 = shalt.err (!%p195_p1)
}
  0x22   :  { %23 = dma.hbm_to_vmem [thread:$0]  %s371_s0, 256, %s21_s18, [#allocation3]  }
  0x23   :  { %s275_s12 = smov [#allocation7]   ;;  %s199_s16 = scalar_lea.hbm %s373_s2, 256 }
  0x24   :  { %s40_s13 = sshll.u32 %s275_s12, 4  ;;  %p200_p2 = scmp.ne.s32.totalorder %s373_s2, %s199_s16  ;;  %s41_s13 = int_to_ptr.vmem [resolvable:$true] %s40_s13 }
  0x25   :  { %p203_p3 = scmp.lt.u32.totalorder %s199_s16, %s373_s2 }
  0x27   :  { %p205_p4 = pnand %p203_p3, %p200_p2 }
  0x29   :  { %208 = shalt.err (!%p205_p4)
}
  0x2a   :  { %s209_s22 = scalar_lea.vmem %s41_s13, 256  ;;  %p214_p6 = scmp.lt.s32.totalorder %s41_s13, %s41_s13 }
  0x2b   :  { %p210_p5 = scmp.ne.s32.totalorder %s41_s13, %s209_s22  ;;  %p215_p7 = scmp.lt.s32.totalorder %s209_s22, %s209_s22 }
  0x2d   :  { %p216_p8 = por %p215_p7, %p214_p6 }
  0x2f   :  { %p217_p9 = pnand %p216_p8, %p210_p5 }
  0x31   :  { %220 = shalt.err (!%p217_p9)
}
  0x32   :  { %43 = dma.hbm_to_vmem [thread:$0]  %s373_s2, 256, %s41_s13, [#allocation6]  }
  0x33   :  { %265 = dma.done.wait [#allocation3], 256  }
  0x34   :  { %266 = vsyncadd [#allocation3], 4294967040 }
  0x35   :  { %267 = dma.done.wait [#allocation6], 512  }
  0x36   :  { %268 = vsyncadd [#allocation6], 4294966784  ;;  %v53_v0 = vld [vmem:[#allocation2] sm:$0xff]  ;;  %v340_v1 = vld [vmem:[#allocation5] sm:$0xff]  ;;  %s276_s2 = smov [#allocation8]   ;;  %v277_v29 = vmov 0.0  }
  0x37   :  { %147 = vlog2.f32 %v53_v0  ;;  %v71_v2 = vsub.f32 1.0, %v53_v0  ;;  %v54_v3 = vld [vmem:[#allocation2 + $0x8] sm:$0xff]  ;;  %v56_v4 = vld [vmem:[#allocation5 + $0x8] sm:$0xff]  ;;  %v95_v6 = vadd.f32 %v340_v1, %v53_v0  ;;  %v97_v7 = vmul.f32 2.0, %v53_v0  ;;  %v57_v13 = vld [vmem:[#allocation7] sm:$0xff]  ;;  %s115_s23 = sshll.u32 %s276_s2, 4  ;;  %s116_s23 = int_to_ptr.vmem [resolvable:$true] %s115_s23 }
  0x38   :  { %149 = vlog2.f32 %v54_v3  ;;  %v72_v5 = vsub.f32 1.0, %v54_v3  ;;  %v96_v8 = vadd.f32 %v56_v4, %v54_v3  ;;  %v98_v9 = vmul.f32 2.0, %v54_v3  ;;  %v58_v15 = vld [vmem:[#allocation7 + $0x8] sm:$0xff]  ;;  %s221_s24 = scalar_lea.vmem %s116_s23, 256  ;;  %p226_p11 = scmp.lt.s32.totalorder %s116_s23, %s116_s23 }
  0x39   :  { %151 = vlog2.f32 %v71_v2  ;;  %v99_v10 = vmul.f32 %v97_v7, %v340_v1  ;;  %vm59_vm0 = vcmp.gt.f32.partialorder %v57_v13, 0.8  ;;  %vm60_vm1 = vcmp.gt.f32.partialorder %v58_v15, 0.8  ;;  %p222_p10 = scmp.ne.s32.totalorder %s116_s23, %s221_s24  ;;  %p227_p12 = scmp.lt.s32.totalorder %s221_s24, %s221_s24 }
  0x3a   :  { %153 = vlog2.f32 %v72_v5  ;;  %v100_v11 = vmul.f32 %v98_v9, %v56_v4  ;;  %v83_v28 = vsub.f32 1.0, %v340_v1  ;;  %v139_v30 = vsel %vm59_vm0, 1.0, %v277_v29 }
  0x3b   :  { %v101_v12 = vsub.f32 %v95_v6, %v99_v10  ;;  %v84_v33 = vsub.f32 1.0, %v56_v4  ;;  %v140_v36 = vsel %vm60_vm1, 1.0, %v277_v29  ;;  %p228_p13 = por %p227_p12, %p226_p11 }
  0x3c   :  { %v102_v14 = vsub.f32 %v96_v8, %v100_v11 }
  0x3d   :  { %v103_v16 = vmul.f32 %v101_v12, %v101_v12  ;;  %p229_p0 = pnand %p228_p13, %p222_p10 }
  0x3e   :  { %v104_v18 = vmul.f32 %v102_v14, %v102_v14 }
  0x3f   :  { %v105_v21 = vmul.f32 0.5, %v103_v16 }
  0x40   :  { %v106_v24 = vmul.f32 0.5, %v104_v18 }
  0x41   :  { %v148_v17 = vpop.eup %147  ;;  %107 = vst [vmem:[#allocation8] sm:$0xff] %v105_v21 }
  0x42   :  { %v150_v19 = vpop.eup %149  ;;  %v66_v20 = vmul.f32 0.6931472, %v148_v17  ;;  %108 = vst [vmem:[#allocation8 + $0x8] sm:$0xff] %v106_v24 }
  0x43   :  { %v152_v22 = vpop.eup %151  ;;  %v68_v23 = vmul.f32 0.6931472, %v150_v19 }
  0x44   :  { %v154_v25 = vpop.eup %153  ;;  %v69_v26 = vmax.f32 %v66_v20, -100.0  ;;  %v74_v27 = vmul.f32 0.6931472, %v152_v22 }
  0x45   :  { %v70_v31 = vmax.f32 %v68_v23, -100.0  ;;  %v76_v32 = vmul.f32 0.6931472, %v154_v25 }
  0x46   :  { %v77_v34 = vmax.f32 %v74_v27, -100.0  ;;  %v81_v35 = vmul.f32 %v69_v26, %v340_v1 }
  0x47   :  { %232 = shalt.err (!%p229_p0)
}
  0x48   :  { %s233_s27 = scalar_lea.hbm %s374_s3, 256 }
  0x49   :  { %p234_p1 = scmp.ne.s32.totalorder %s374_s3, %s233_s27  ;;  %p237_p2 = scmp.lt.u32.totalorder %s233_s27, %s374_s3 }
  0x4b   :  { %p239_p3 = pnand %p237_p2, %p234_p1 }
  0x4d   :  { %242 = shalt.err (!%p239_p3)
}
  0x4e   :  { %118 = dma.vmem_to_hbm [thread:$0]  %s116_s23, 256, %s374_s3, [#allocation4]   ;;  %v78_v37 = vmax.f32 %v76_v32, -100.0  ;;  %v82_v38 = vmul.f32 %v70_v31, %v56_v4  ;;  %v79_v39 = vsub.f32 0.0, %v139_v30  ;;  %v85_v40 = vmul.f32 %v83_v28, %v77_v34 }
  0x4f   :  { %v80_v41 = vsub.f32 0.0, %v140_v36  ;;  %s278_s8 = smov [#allocation9]  }
  0x50   :  { %v86_v42 = vmul.f32 %v84_v33, %v78_v37  ;;  %v87_v43 = vadd.f32 %v85_v40, %v81_v35  ;;  %s125_s9 = sshll.u32 %s278_s8, 4  ;;  %s126_s9 = int_to_ptr.vmem [resolvable:$true] %s125_s9 }
  0x51   :  { %s243_s10 = scalar_lea.vmem %s126_s9, 256  ;;  %p248_p5 = scmp.lt.s32.totalorder %s126_s9, %s126_s9 }
  0x52   :  { %v88_v44 = vadd.f32 %v86_v42, %v82_v38  ;;  %v89_v45 = vmul.f32 %v87_v43, %v79_v39  ;;  %p244_p4 = scmp.ne.s32.totalorder %s126_s9, %s243_s10  ;;  %p249_p6 = scmp.lt.s32.totalorder %s243_s10, %s243_s10 }
  0x54   :  { %v90_v46 = vmul.f32 %v88_v44, %v80_v41  ;;  %93 = vst [vmem:[#allocation9] sm:$0xff] %v89_v45  ;;  %p250_p7 = por %p249_p6, %p248_p5 }
  0x56   :  { %94 = vst [vmem:[#allocation9 + $0x8] sm:$0xff] %v90_v46  ;;  %p251_p8 = pnand %p250_p7, %p244_p4 }
  0x58   :  { %254 = shalt.err (!%p251_p8)
}
  0x59   :  { %s255_s11 = scalar_lea.hbm %s375_s4, 256 }
  0x5a   :  { %p256_p9 = scmp.ne.s32.totalorder %s375_s4, %s255_s11  ;;  %p259_p10 = scmp.lt.u32.totalorder %s255_s11, %s375_s4 }
  0x5c   :  { %p261_p11 = pnand %p259_p10, %p256_p9 }
  0x5e   :  { %264 = shalt.err (!%p261_p11)
}
  0x5f   :  { %128 = dma.vmem_to_hbm [thread:$0]  %s126_s9, 256, %s375_s4, [#allocation10]  }
  0x60   :  { %269 = dma.done.wait [#allocation4], 256  }
  0x61   :  { %270 = vsyncadd [#allocation4], 4294967040 }
  0x62   :  { %271 = dma.done.wait [#allocation10], 256  }
  0x63   :  { %272 = vsyncadd [#allocation10], 4294967040 }
  0x64   :  { %135 = vsyncpa [#allocation3], 1 }
  0x65   :  { %136 = vsyncpa [#allocation6], 1 }
  0x66   :  { %137 = vsyncpa [#allocation4], 1 }
  0x67   :  { %138 = vsyncpa [#allocation10], 1 }

</bundles_post_ra>
